<compile_context>
chip_gen: v7x
topology: tpu7x:2x2x1
jax: 0.10.0
libtpu: 0.0.40
codegen_flags: <defaults>
</compile_context>

<pallas_src>
import functools

import jax
import jax.numpy as jnp
from jax import lax
from jax.experimental import pallas as pl
from jax.experimental.pallas import tpu as pltpu


def _make_fused_kernel(inv_n, eps):
    def kernel(x_ref, wt_ref, gb_ref, o_ref, sum_ref, sumsq_ref):
        p = pl.program_id(0)      # 0 = stats pass, 1 = apply pass
        i = pl.program_id(1)      # batch tile

        # Shared tile matmul on the MXU, f32 accumulation.  wt is already
        # (in, out) so this is a plain contraction (no in-kernel transpose).
        y = jnp.dot(x_ref[...], wt_ref[...], preferred_element_type=jnp.float32)

        # ---- pass 0: accumulate per-column sum / sum-of-squares ------------
        @pl.when(p == 0)
        def _stats():
            @pl.when(i == 0)
            def _():
                sum_ref[...] = jnp.zeros_like(sum_ref)
                sumsq_ref[...] = jnp.zeros_like(sumsq_ref)
            sum_ref[...] += jnp.sum(y, axis=0, keepdims=True)
            sumsq_ref[...] += jnp.sum(y * y, axis=0, keepdims=True)

        # ---- pass boundary: fold BN into scale/shift (runs exactly once) ---
        @pl.when((p == 1) & (i == 0))
        def _fold():
            mean = sum_ref[...] * inv_n
            var = jnp.maximum(sumsq_ref[...] * inv_n - mean * mean, 0.0)
            scale = gb_ref[0:1, :] * lax.rsqrt(var + eps)
            shift = gb_ref[1:2, :] - mean * scale
            # Reuse the accumulators as the folded scale / shift.
            sum_ref[...] = scale
            sumsq_ref[...] = shift

        # ---- pass 1: recompute tile matmul + folded BN + ReLU ---------------
        @pl.when(p == 1)
        def _apply():
            z = y * sum_ref[...] + sumsq_ref[...]
            o_ref[...] = jnp.maximum(z, 0.0).astype(o_ref.dtype)

    return kernel


def fcblock_forward(x, weight, bias, gamma, beta, *,
                    block_rows=1024, use_bf16_matmul=True,
                    out_dtype=jnp.float32,
                    vmem_budget_bytes=40 * 1024 * 1024,
                    vmem_limit_bytes=64 * 1024 * 1024):
    """Fused Linear(H->H) -> BatchNorm1d(training batch stats) -> ReLU.

    x: (N, H) float32.  weight: (H, H) PyTorch (out_features, in_features)
    layout.  bias/gamma/beta: (H,).
    """
    # `bias` is accepted for API parity with nn.Linear but is mathematically
    # dead here: training-mode BN's mean subtraction cancels it exactly.
    # (Not valid for eval-mode / running-stat BN.)
    del bias
    n, h = x.shape
    eps = 1e-5

    # Lane-dense hidden dim: pad H up to a multiple of 128.
    hp = max(128, -(-h // 128) * 128)

    mm_dtype = jnp.bfloat16 if use_bf16_matmul else jnp.float32
    xb = jnp.dtype(mm_dtype).itemsize
    ob = jnp.dtype(out_dtype).itemsize

    # One-time wrapper-side weight prep: transpose to (in, out) and zero-pad
    # to (Hp, Hp).  Padded output columns of y are exactly 0 (no bias), padded
    # input columns of x are 0, so BN statistics over the real columns are
    # unchanged.
    wt = jnp.zeros((hp, hp), mm_dtype).at[:h, :h].set(weight.T.astype(mm_dtype))

    # gamma/beta packed into one lane-dense (2, Hp) f32 input.
    gb = jnp.zeros((2, hp), jnp.float32)
    gb = gb.at[0, :h].set(gamma.astype(jnp.float32))
    gb = gb.at[1, :h].set(beta.astype(jnp.float32))

    # ---- batch tile size ----------------------------------------------------
    # Single tile for small batches (multiple of 8); otherwise multiples of 128
    # (MXU row fill), shrunk in 128-steps while the VMEM budget binds.  The
    # budget counts BOTH pipeline buffers of the (constant-index) W, plus the
    # double-buffered x and out tiles.
    tm = -(-min(n, block_rows) // 8) * 8
    if tm > 128:
        tm = (tm // 128) * 128
    w_bytes = 2 * hp * hp * xb
    while tm > 128 and (w_bytes + 2 * tm * hp * (xb + ob)) > vmem_budget_bytes:
        tm -= 128

    n_pad = -(-n // tm) * tm
    nt = n_pad // tm

    x_mm = x.astype(mm_dtype)
    if n_pad != n or hp != h:
        # Zero rows/cols contribute exactly 0 to sum / sum-of-squares (there is
        # no bias), so full-batch stats stay exact; we divide by the true n.
        x_mm = jnp.pad(x_mm, ((0, n_pad - n), (0, hp - h)))

    x_spec = pl.BlockSpec((tm, hp), lambda p, i: (i, 0))
    w_spec = pl.BlockSpec((hp, hp), lambda p, i: (0, 0))      # resident
    gb_spec = pl.BlockSpec((2, hp), lambda p, i: (0, 0))      # resident
    # i*p: during the stats pass (p=0) the output block index never changes,
    # so no garbage tile is DMA'd back; pass 1 writes every block exactly once.
    o_spec = pl.BlockSpec((tm, hp), lambda p, i: (i * p, 0))

    kernel = _make_fused_kernel(1.0 / n, eps)

    out = pl.pallas_call(
        kernel,
        out_shape=jax.ShapeDtypeStruct((n_pad, hp), out_dtype),
        grid_spec=pltpu.PrefetchScalarGridSpec(
            num_scalar_prefetch=0,
            grid=(2, nt),                      # (pass, batch tile)
            in_specs=[x_spec, w_spec, gb_spec],
            out_specs=o_spec,
            scratch_shapes=[pltpu.VMEM((1, hp), jnp.float32),   # sum  -> scale
                            pltpu.VMEM((1, hp), jnp.float32)],  # sumsq-> shift
        ),
        compiler_params=pltpu.CompilerParams(
            dimension_semantics=("arbitrary", "arbitrary"),
            vmem_limit_bytes=vmem_limit_bytes),
    )(x_mm, wt, gb)

    return out[:n, :h]


if __name__ == "__main__":
    num_hidden = 32
    batch = 8

    key = jax.random.PRNGKey(0)
    kx, kw, kb = jax.random.split(key, 3)

    # Deterministic PyTorch-style init.
    bound = 1.0 / (num_hidden ** 0.5)
    weight = jax.random.uniform(kw, (num_hidden, num_hidden),
                                minval=-bound, maxval=bound, dtype=jnp.float32)
    bias = jax.random.uniform(kb, (num_hidden,),
                              minval=-bound, maxval=bound, dtype=jnp.float32)
    gamma = jnp.ones((num_hidden,), jnp.float32)    # BatchNorm1d weight init
    beta = jnp.zeros((num_hidden,), jnp.float32)    # BatchNorm1d bias init
    x = jax.random.normal(kx, (batch, num_hidden), dtype=jnp.float32)

    fwd = jax.jit(fcblock_forward,
                  static_argnames=("block_rows", "use_bf16_matmul", "out_dtype",
                                   "vmem_budget_bytes", "vmem_limit_bytes"))

    # Pure-JAX f32 reference (PyTorch semantics: Linear bias included,
    # training-mode BN with biased batch stats, eps=1e-5, then ReLU).
    y_ref = x @ weight.T + bias
    mu = y_ref.mean(axis=0, keepdims=True)
    var = ((y_ref - mu) ** 2).mean(axis=0, keepdims=True)
    ref_f32 = jnp.maximum(gamma * (y_ref - mu) / jnp.sqrt(var + 1e-5) + beta, 0.0)

    # f32 MXU path: tight check against the PyTorch-faithful reference.
    out_f32 = jax.block_until_ready(
        fwd(x, weight, bias, gamma, beta, use_bf16_matmul=False))
    assert out_f32.shape == (batch, num_hidden)
    assert jnp.allclose(out_f32, ref_f32, atol=1e-4, rtol=1e-4), \
        "f32 kernel mismatch vs reference"

    # bf16 MXU path (v6e/v7x throughput path): compare against a reference
    # that uses the same bf16 matmul precision (BN/ReLU still in f32).
    y_bf = jnp.dot(x.astype(jnp.bfloat16), weight.astype(jnp.bfloat16).T,
                   preferred_element_type=jnp.float32)
    mu_b = y_bf.mean(axis=0, keepdims=True)
    var_b = ((y_bf - mu_b) ** 2).mean(axis=0, keepdims=True)
    ref_bf16 = jnp.maximum(gamma * (y_bf - mu_b) / jnp.sqrt(var_b + 1e-5) + beta, 0.0)

    out_bf16 = jax.block_until_ready(
        fwd(x, weight, bias, gamma, beta, use_bf16_matmul=True))
    assert jnp.allclose(out_bf16, ref_bf16, atol=5e-3, rtol=5e-3), \
        "bf16 kernel mismatch vs bf16 reference"

    print("KERNEL_OK")
</pallas_src>

<mosaic_0001>
module attributes {stable_mosaic.version = 11 : i64} {
  func.func @kernel(%arg0: i32, %arg1: i32, %arg2: memref<8x128xf32, #tpu.memory_space<vmem>>, %arg3: memref<128x128xf32, #tpu.memory_space<vmem>>, %arg4: memref<2x128xf32, #tpu.memory_space<vmem>>, %arg5: memref<8x128xf32, #tpu.memory_space<vmem>>, %arg6: memref<1x128xf32, #tpu.memory_space<vmem>>, %arg7: memref<1x128xf32, #tpu.memory_space<vmem>>) attributes {dimension_semantics = [#tpu.dimension_semantics<arbitrary>, #tpu.dimension_semantics<arbitrary>], iteration_bounds = array<i64: 2, 1>, scalar_prefetch = 0 : i64, scratch_operands = 2 : i64, tpu.core_type = #tpu.core_type<tc>, window_params = [{transform_indices = @transform_0, window_bounds = array<i64: 8, 128>}, {pipeline_mode = #tpu.pipeline_mode<synchronous>, transform_indices = @transform_1, window_bounds = array<i64: 128, 128>}, {pipeline_mode = #tpu.pipeline_mode<synchronous>, transform_indices = @transform_2, window_bounds = array<i64: 2, 128>}, {transform_indices = @transform_3, window_bounds = array<i64: 8, 128>}]} {
    %c0 = arith.constant 0 : index
    %c0_0 = arith.constant 0 : index
    %0 = vector.load %arg2[%c0, %c0_0] : memref<8x128xf32, #tpu.memory_space<vmem>>, vector<8x128xf32>
    %c0_1 = arith.constant 0 : index
    %c0_2 = arith.constant 0 : index
    %1 = vector.load %arg3[%c0_1, %c0_2] : memref<128x128xf32, #tpu.memory_space<vmem>>, vector<128x128xf32>
    %cst = arith.constant dense<0.000000e+00> : vector<8x128xf32>
    %2 = tpu.matmul %0, %1, %cst {dimension_numbers = #tpu.dot_dimension_numbers<[1], [0], [0], [1], [0, 0, 1, 1], [], []>} : vector<8x128xf32>, vector<128x128xf32>, vector<8x128xf32> -> vector<8x128xf32>
    %c0_i32 = arith.constant 0 : i32
    %3 = arith.cmpi eq, %arg0, %c0_i32 : i32
    %4 = arith.extui %3 : i1 to i32
    %c0_i32_3 = arith.constant 0 : i32
    %5 = arith.cmpi ne, %4, %c0_i32_3 : i32
    scf.if %5 {
      %c0_i32_8 = arith.constant 0 : i32
      %14 = arith.cmpi eq, %arg1, %c0_i32_8 : i32
      %15 = arith.extui %14 : i1 to i32
      %c0_i32_9 = arith.constant 0 : i32
      %16 = arith.cmpi ne, %15, %c0_i32_9 : i32
      scf.if %16 {
        %cst_20 = arith.constant 0.000000e+00 : f32
        %28 = vector.broadcast %cst_20 : f32 to vector<1x128xf32>
        %c0_21 = arith.constant 0 : index
        %c0_22 = arith.constant 0 : index
        %29 = vector.load %arg6[%c0_21, %c0_22] : memref<1x128xf32, #tpu.memory_space<vmem>>, vector<1x128xf32>
        tpu.vector_store %arg6[%c0_21, %c0_22], %28 {strides = array<i32>} : memref<1x128xf32, #tpu.memory_space<vmem>>, vector<1x128xf32>,
        %cst_23 = arith.constant 0.000000e+00 : f32
        %30 = vector.broadcast %cst_23 : f32 to vector<1x128xf32>
        %c0_24 = arith.constant 0 : index
        %c0_25 = arith.constant 0 : index
        %31 = vector.load %arg7[%c0_24, %c0_25] : memref<1x128xf32, #tpu.memory_space<vmem>>, vector<1x128xf32>
        tpu.vector_store %arg7[%c0_24, %c0_25], %30 {strides = array<i32>} : memref<1x128xf32, #tpu.memory_space<vmem>>, vector<1x128xf32>,
      } else {
      }
      %c0_10 = arith.constant 0 : index
      %c0_11 = arith.constant 0 : index
      %17 = vector.load %arg6[%c0_10, %c0_11] : memref<1x128xf32, #tpu.memory_space<vmem>>, vector<1x128xf32>
      %cst_12 = arith.constant dense<0.000000e+00> : vector<128xf32>
      %18 = vector.multi_reduction <add>, %2, %cst_12 [0] : vector<8x128xf32> to vector<128xf32>
      %19 = vector.shape_cast %18 : vector<128xf32> to vector<1x128xf32>
      %20 = arith.addf %17, %19 : vector<1x128xf32>
      %c0_13 = arith.constant 0 : index
      %c0_14 = arith.constant 0 : index
      %21 = vector.load %arg6[%c0_13, %c0_14] : memref<1x128xf32, #tpu.memory_space<vmem>>, vector<1x128xf32>
      tpu.vector_store %arg6[%c0_13, %c0_14], %20 {strides = array<i32>} : memref<1x128xf32, #tpu.memory_space<vmem>>, vector<1x128xf32>,
      %c0_15 = arith.constant 0 : index
      %c0_16 = arith.constant 0 : index
      %22 = vector.load %arg7[%c0_15, %c0_16] : memref<1x128xf32, #tpu.memory_space<vmem>>, vector<1x128xf32>
      %23 = arith.mulf %2, %2 : vector<8x128xf32>
      %cst_17 = arith.constant dense<0.000000e+00> : vector<128xf32>
      %24 = vector.multi_reduction <add>, %23, %cst_17 [0] : vector<8x128xf32> to vector<128xf32>
      %25 = vector.shape_cast %24 : vector<128xf32> to vector<1x128xf32>
      %26 = arith.addf %22, %25 : vector<1x128xf32>
      %c0_18 = arith.constant 0 : index
      %c0_19 = arith.constant 0 : index
      %27 = vector.load %arg7[%c0_18, %c0_19] : memref<1x128xf32, #tpu.memory_space<vmem>>, vector<1x128xf32>
      tpu.vector_store %arg7[%c0_18, %c0_19], %26 {strides = array<i32>} : memref<1x128xf32, #tpu.memory_space<vmem>>, vector<1x128xf32>,
    } else {
    }
    %c1_i32 = arith.constant 1 : i32
    %6 = arith.cmpi eq, %arg0, %c1_i32 : i32
    %c0_i32_4 = arith.constant 0 : i32
    %7 = arith.cmpi eq, %arg1, %c0_i32_4 : i32
    %8 = arith.andi %6, %7 : i1
    %9 = arith.extui %8 : i1 to i32
    %c0_i32_5 = arith.constant 0 : i32
    %10 = arith.cmpi ne, %9, %c0_i32_5 : i32
    scf.if %10 {
      %c0_8 = arith.constant 0 : index
      %c0_9 = arith.constant 0 : index
      %14 = vector.load %arg6[%c0_8, %c0_9] : memref<1x128xf32, #tpu.memory_space<vmem>>, vector<1x128xf32>
      %cst_10 = arith.constant 1.250000e-01 : f32
      %15 = vector.broadcast %cst_10 : f32 to vector<1x128xf32>
      %16 = arith.mulf %14, %15 : vector<1x128xf32>
      %c0_11 = arith.constant 0 : index
      %c0_12 = arith.constant 0 : index
      %17 = vector.load %arg7[%c0_11, %c0_12] : memref<1x128xf32, #tpu.memory_space<vmem>>, vector<1x128xf32>
      %cst_13 = arith.constant 1.250000e-01 : f32
      %18 = vector.broadcast %cst_13 : f32 to vector<1x128xf32>
      %19 = arith.mulf %17, %18 : vector<1x128xf32>
      %20 = arith.mulf %16, %16 : vector<1x128xf32>
      %21 = arith.subf %19, %20 : vector<1x128xf32>
      %cst_14 = arith.constant 0.000000e+00 : f32
      %22 = vector.broadcast %cst_14 : f32 to vector<1x128xf32>
      %23 = arith.maximumf %21, %22 : vector<1x128xf32>
      %c0_15 = arith.constant 0 : index
      %c0_16 = arith.constant 0 : index
      %24 = vector.load %arg4[%c0_15, %c0_16] : memref<2x128xf32, #tpu.memory_space<vmem>>, vector<1x128xf32>
      %cst_17 = arith.constant 9.99999974E-6 : f32
      %25 = vector.broadcast %cst_17 : f32 to vector<1x128xf32>
      %26 = arith.addf %23, %25 : vector<1x128xf32>
      %27 = math.rsqrt %26 : vector<1x128xf32>
      %28 = arith.mulf %24, %27 : vector<1x128xf32>
      %c1 = arith.constant 1 : index
      %c0_18 = arith.constant 0 : index
      %29 = vector.load %arg4[%c1, %c0_18] : memref<2x128xf32, #tpu.memory_space<vmem>>, vector<1x128xf32>
      %30 = arith.mulf %16, %28 : vector<1x128xf32>
      %31 = arith.subf %29, %30 : vector<1x128xf32>
      %c0_19 = arith.constant 0 : index
      %c0_20 = arith.constant 0 : index
      %32 = vector.load %arg6[%c0_19, %c0_20] : memref<1x128xf32, #tpu.memory_space<vmem>>, vector<1x128xf32>
      tpu.vector_store %arg6[%c0_19, %c0_20], %28 {strides = array<i32>} : memref<1x128xf32, #tpu.memory_space<vmem>>, vector<1x128xf32>,
      %c0_21 = arith.constant 0 : index
      %c0_22 = arith.constant 0 : index
      %33 = vector.load %arg7[%c0_21, %c0_22] : memref<1x128xf32, #tpu.memory_space<vmem>>, vector<1x128xf32>
      tpu.vector_store %arg7[%c0_21, %c0_22], %31 {strides = array<i32>} : memref<1x128xf32, #tpu.memory_space<vmem>>, vector<1x128xf32>,
    } else {
    }
    %c1_i32_6 = arith.constant 1 : i32
    %11 = arith.cmpi eq, %arg0, %c1_i32_6 : i32
    %12 = arith.extui %11 : i1 to i32
    %c0_i32_7 = arith.constant 0 : i32
    %13 = arith.cmpi ne, %12, %c0_i32_7 : i32
    scf.if %13 {
      %c0_8 = arith.constant 0 : index
      %c0_9 = arith.constant 0 : index
      %14 = vector.load %arg6[%c0_8, %c0_9] : memref<1x128xf32, #tpu.memory_space<vmem>>, vector<1x128xf32>
      %15 = vector.broadcast %14 : vector<1x128xf32> to vector<8x128xf32>
      %16 = arith.mulf %2, %15 : vector<8x128xf32>
      %c0_10 = arith.constant 0 : index
      %c0_11 = arith.constant 0 : index
      %17 = vector.load %arg7[%c0_10, %c0_11] : memref<1x128xf32, #tpu.memory_space<vmem>>, vector<1x128xf32>
      %18 = vector.broadcast %17 : vector<1x128xf32> to vector<8x128xf32>
      %19 = arith.addf %16, %18 : vector<8x128xf32>
      %cst_12 = arith.constant 0.000000e+00 : f32
      %20 = vector.broadcast %cst_12 : f32 to vector<8x128xf32>
      %21 = arith.maximumf %19, %20 : vector<8x128xf32>
      %c0_13 = arith.constant 0 : index
      %c0_14 = arith.constant 0 : index
      %22 = vector.load %arg5[%c0_13, %c0_14] : memref<8x128xf32, #tpu.memory_space<vmem>>, vector<8x128xf32>
      tpu.vector_store %arg5[%c0_13, %c0_14], %21 {strides = array<i32>} : memref<8x128xf32, #tpu.memory_space<vmem>>, vector<8x128xf32>,
    } else {
    }
    return
  }
  func.func @transform_0(%arg0: i32, %arg1: i32) -> (i32, i32) {
    %c0_i32 = arith.constant 0 : i32
    %c0_i32_0 = arith.constant 0 : i32
    return %arg1, %c0_i32 : i32, i32
  }
  func.func @transform_1(%arg0: i32, %arg1: i32) -> (i32, i32) {
    %c0_i32 = arith.constant 0 : i32
    %c0_i32_0 = arith.constant 0 : i32
    %c0_i32_1 = arith.constant 0 : i32
    return %c0_i32, %c0_i32_0 : i32, i32
  }
  func.func @transform_2(%arg0: i32, %arg1: i32) -> (i32, i32) {
    %c0_i32 = arith.constant 0 : i32
    %c0_i32_0 = arith.constant 0 : i32
    %c0_i32_1 = arith.constant 0 : i32
    return %c0_i32, %c0_i32_0 : i32, i32
  }
  func.func @transform_3(%arg0: i32, %arg1: i32) -> (i32, i32) {
    %0 = arith.muli %arg1, %arg0 : i32
    %c0_i32 = arith.constant 0 : i32
    %c0_i32_0 = arith.constant 0 : i32
    return %0, %c0_i32 : i32, i32
  }
}

</mosaic_0001>

<bundles_post_ra>
// kernel: fcblock_forward.1
= control target key start
LH: loop header
LB: loop body
LE: loop exit
PB: predicated region body
PF: predicated region fallthrough
CT: control target
= control target key end

     0   :  { %8 = vsyncpa [#allocation5], 0  ;;  %s975_s0 = inlined_call_operand.hbm [shape: f32[8,128], index: 0, kind: input, shape index: {}]   ;;  %s976_s1 = inlined_call_operand.hbm [shape: f32[128,128], index: 1, kind: input, shape index: {}]   ;;  %s977_s2 = inlined_call_operand.hbm [shape: f32[2,128], index: 2, kind: input, shape index: {}]   ;;  %s978_s3 = inlined_call_operand.hbm [shape: f32[8,128], index: 3, kind: output, shape index: {}]  }
   0x1   :  { %9 = vsyncpa [#allocation8], 0 }
   0x2   :  { %10 = vsyncpa [#allocation6], 0 }
   0x3   :  { %12 = vsyncpa [#allocation6 + $0x1], 0  ;;  %s820_s12 = smov 0   ;;  %s822_s13 = smov 0  }
   0x4   :  { %s824_s14 = smov 0  }
   0x5 LB: > { %s790_s15 = smov [#allocation7]   ;;  %s473_s17 = sadd.s32 4294967295, %s788_s14   ;;  %s788_s14 = sphi %s824_s14, %s18_s14   ;;  %s784_s13 = sphi %s822_s13, %s992_s13   ;;  %s780_s12 = sphi %s820_s12, %s991_s12  }
   0x6   : > { %s156_s16 = sshll.u32 %s790_s15, 4  ;;  %s474_s18 = sadd.s32 4294967294, %s788_s14   ;;  %s157_s16 = int_to_ptr.vmem [resolvable:$true] %s156_s16 }
   0x7   : > { %p475_p0 = scmp.ge.s32.totalorder %s788_s14, 1  ;;  %p131_p1 = scmp.lt.s32.totalorder %s788_s14, 3 }
   0x8   : > { %p841_p2 = scmp.eq.s32.totalorder %s473_s17, 0  ;;  %s30_s22 = sadd.s32 1, %s784_s13 }
   0x9   : > { %p845_p3 = pnand %p475_p0, %p131_p1  ;;  %p858_p6 = scmp.ge.s32.totalorder %s30_s22, 2 }
   0xa   : > { %s982_s19 = scalar_select %p841_p2, 1, 0 }
   0xb   : > { %s983_s20 = scalar_select %p845_p3, 1, 0 }
   0xc   : > { %p585_p4 = pneg %p845_p3  ;;  %s644_s26 = scalar_lea.hbm %s976_s1, 2048 }
   0xd   : > { %s985_s23 = scalar_select %p858_p6, 1, 0 }
   0xe   : > { %p853_p5 = pnand %p841_p2, %p585_p4  ;;  %p645_p7 = scmp.ne.s32.totalorder %s976_s1, %s644_s26 }
   0xf   : > { %p651_p11 = scmp.lt.u32.totalorder %s644_s26, %s976_s1 }
  0x10   : > { %p870_p8 = pneg %p853_p5 }
  0x12   : > { %p647_p9 = pnand %p870_p8, %p645_p7 }
  0x14   : > { %p648_p10 = pneg %p647_p9 }
  0x16   : > { %p653_p12 = pnand %p651_p11, %p648_p10 }
  0x18   : > { %656 = shalt.err (!%p653_p12)
}
  0x19   : > { %s657_s5 = scalar_lea.vmem %s157_s16, 2048  ;;  %p665_p4 = scmp.lt.s32.totalorder %s157_s16, %s157_s16 }
  0x1a   : > { %p658_p13 = scmp.ne.s32.totalorder %s157_s16, %s657_s5  ;;  %p666_p2 = scmp.lt.s32.totalorder %s657_s5, %s657_s5 }
  0x1c   : > { %p660_p0 = pnand %p658_p13, %p870_p8  ;;  %p667_p3 = por %p666_p2, %p665_p4 }
  0x1e   : > { %p661_p1 = pneg %p660_p0 }
  0x20   : > { %p668_p6 = pnand %p667_p3, %p661_p1 }
  0x22   : > { %671 = shalt.err (!%p668_p6)
}
  0x23   : > { %s791_s6 = smov 128   ;;  %s792_s7 = smov 8  }
  0x24   : > { %591 = dma.hbm_to_vmem [thread:$0]  (!%p853_p5), %s976_s1, 2048, %s157_s16, [#allocation8], %s791_s6, %s791_s6, %s792_s7  }
  0x25   : > { %p987_p7 = scmp.ne.s32.totalorder %s985_s23, 0  ;;  %s793_s10 = smov [#allocation4]  }
  0x26   : > { %s146_s11 = sshll.u32 %s793_s10, 4  ;;  %s794_s15 = smov [#allocation9]   ;;  %s147_s11 = int_to_ptr.vmem [resolvable:$true] %s146_s11 }
  0x27   : > { %s994_s22 = smov (%p987_p7, %s30_s22), 0  ;;  %s170_s24 = sshll.u32 %s794_s15, 4  ;;  %s171_s24 = int_to_ptr.vmem [resolvable:$true] %s170_s24 }
  0x28   : > { %s672_s27 = scalar_lea.hbm %s975_s0, 128 }
  0x29   : > { %p673_p2 = scmp.ne.s32.totalorder %s975_s0, %s672_s27  ;;  %p679_p9 = scmp.lt.u32.totalorder %s672_s27, %s975_s0 }
  0x2b   : > { %p675_p3 = pnand %p673_p2, %p870_p8 }
  0x2d   : > { %p676_p6 = pneg %p675_p3 }
  0x2f   : > { %p681_p10 = pnand %p679_p9, %p676_p6 }
  0x31   : > { %684 = shalt.err (!%p681_p10)
}
  0x32   : > { %s685_s4 = scalar_lea.vmem %s147_s11, 128  ;;  %p693_p0 = scmp.lt.s32.totalorder %s147_s11, %s147_s11 }
  0x33   : > { %p686_p11 = scmp.ne.s32.totalorder %s147_s11, %s685_s4  ;;  %p694_p1 = scmp.lt.s32.totalorder %s685_s4, %s685_s4 }
  0x35   : > { %p688_p12 = pnand %p686_p11, %p870_p8  ;;  %p695_p4 = por %p694_p1, %p693_p0 }
  0x37   : > { %p689_p13 = pneg %p688_p12 }
  0x39   : > { %p696_p7 = pnand %p695_p4, %p689_p13 }
  0x3b   : > { %699 = shalt.err (!%p696_p7)
}
  0x3c   : > { %588 = dma.hbm_to_vmem [thread:$0]  (!%p853_p5), %s975_s0, 128, %s147_s11, [#allocation5]  }
  0x3d   : > { %s700_s9 = scalar_lea.hbm %s977_s2, 32 }
  0x3e   : > { %p701_p2 = scmp.ne.s32.totalorder %s977_s2, %s700_s9  ;;  %p707_p9 = scmp.lt.u32.totalorder %s700_s9, %s977_s2 }
  0x40   : > { %p703_p3 = pnand %p701_p2, %p870_p8 }
  0x42   : > { %p704_p6 = pneg %p703_p3 }
  0x44   : > { %p709_p10 = pnand %p707_p9, %p704_p6 }
  0x46   : > { %712 = shalt.err (!%p709_p10)
}
  0x47   : > { %s713_s27 = scalar_lea.vmem %s171_s24, 32  ;;  %p721_p0 = scmp.lt.s32.totalorder %s171_s24, %s171_s24 }
  0x48   : > { %p714_p11 = scmp.ne.s32.totalorder %s171_s24, %s713_s27  ;;  %p722_p1 = scmp.lt.s32.totalorder %s713_s27, %s713_s27 }
  0x4a   : > { %p716_p12 = pnand %p714_p11, %p870_p8  ;;  %p723_p4 = por %p722_p1, %p721_p0 }
  0x4c   : > { %p717_p13 = pneg %p716_p12 }
  0x4e   : > { %p724_p7 = pnand %p723_p4, %p717_p13 }
  0x50   : > { %727 = shalt.err (!%p724_p7)
}
  0x51   : > { %594 = dma.hbm_to_vmem [thread:$0]  (!%p853_p5), %s977_s2, 32, %s171_s24, [#allocation8]  }
  0x52   : > { %p988_p2 = scmp.ne.s32.totalorder %s983_s20, 0 }
  0x53   : > { %p989_p3 = scmp.ne.s32.totalorder (!%p988_p2), %s982_s19, 0 }
  0x54   : > { %183 = sbr.rel (%p988_p2) target bundleno = 426 (0x1aa), region = 32 }
  0x5b   : > { %767 = dma.done.wait (%p989_p3), [#allocation5], 128  }
  0x5c   : > { %769 = vsyncadd (%p989_p3), [#allocation5], 4294967168 }
  0x5d   : > { %771 = dma.done.wait (%p989_p3), [#allocation8], 2080  }
  0x5e   : > { %773 = vsyncadd (%p989_p3), [#allocation8], 4294965216  ;;  %v795_v0 = vmov 0.0|0.0   ;;  %vm796_vm0 = vmmov 0   ;;  %v797_v1 = vmov 0.0   ;;  %v212_v2 = vld [vmem:[#allocation7] sm:$0xff] }
  0x5f   : > { %545 = vmatprep.subr.bf16.mxu0 %v795_v0  ;;  %542 = vmatprep.mubr.msk.f32.mxu0 %vm796_vm0, %v797_v1  ;;  %v213_v3 = vld [vmem:[#allocation7 + $0x8] sm:$0xff]  ;;  %v214_v4 = vld [vmem:[#allocation7 + $0x10] sm:$0xff]  ;;  %v215_v6 = vld [vmem:[#allocation7 + $0x18] sm:$0xff]  ;;  %p483_p5 = scmp.ne.s32.totalorder %s780_s12, 0 }
  0x60   : > { %v546_v5 = vpack.c.bf16 %v213_v3, %v212_v2  ;;  %v549_v7 = vpack.c.bf16 %v215_v6, %v214_v4  ;;  %v216_v8 = vld [vmem:[#allocation7 + $0x20] sm:$0xff]  ;;  %v217_v9 = vld [vmem:[#allocation7 + $0x28] sm:$0xff]  ;;  %v218_v11 = vld [vmem:[#allocation7 + $0x30] sm:$0xff]  ;;  %v798_v31 = vmov (!%p483_p5), 0.0  }
  0x61   : > { %v552_v10 = vpack.c.bf16 %v217_v9, %v216_v8  ;;  %v219_v12 = vld [vmem:[#allocation7 + $0x38] sm:$0xff]  ;;  %v220_v14 = vld [vmem:[#allocation7 + $0x40] sm:$0xff]  ;;  %v221_v15 = vld [vmem:[#allocation7 + $0x48] sm:$0xff]  ;;  %306 = vst [vmem:[#allocation2] sm:$0x1] (!%p483_p5), %v798_v31 }
  0x62   : > { %547 = vmatpush3.bf16.msra.mxu0 %v546_v5  ;;  %v555_v13 = vpack.c.bf16 %v219_v12, %v218_v11  ;;  %v558_v16 = vpack.c.bf16 %v221_v15, %v220_v14  ;;  %v222_v17 = vld [vmem:[#allocation7 + $0x50] sm:$0xff]  ;;  %v223_v18 = vld [vmem:[#allocation7 + $0x58] sm:$0xff]  ;;  %v224_v20 = vld [vmem:[#allocation7 + $0x60] sm:$0xff]  ;;  %307 = vst [vmem:[#allocation3] sm:$0x1] (!%p483_p5), %v798_v31 }
  0x63   : > { %548 = vmatprep.subr.bf16.mxu0 %v795_v0  ;;  %v561_v19 = vpack.c.bf16 %v223_v18, %v222_v17  ;;  %v225_v21 = vld [vmem:[#allocation7 + $0x68] sm:$0xff]  ;;  %v226_v23 = vld [vmem:[#allocation7 + $0x70] sm:$0xff]  ;;  %v227_v24 = vld [vmem:[#allocation7 + $0x78] sm:$0xff] }
  0x64   : > { %v564_v22 = vpack.c.bf16 %v225_v21, %v224_v20  ;;  %v567_v25 = vpack.c.bf16 %v227_v24, %v226_v23  ;;  %v211_v26 = vld [vmem:[#allocation4] sm:$0xff] }
  0x66   : > { %550 = vmatpush3.bf16.msra.mxu0 %v549_v7 }
  0x67   : > { %551 = vmatprep.subr.bf16.mxu0 %v795_v0 }
  0x68   : > { %v308_v40 = vld [vmem:[#allocation2] sm:$0x1] (!%p483_p5) }
  0x69   : > { %v317_v43 = vld [vmem:[#allocation3] sm:$0x1] (!%p483_p5) }
  0x6a   : > { %553 = vmatpush3.bf16.msra.mxu0 %v552_v10 }
  0x6b   : > { %554 = vmatprep.subr.bf16.mxu0 %v795_v0 }
  0x6e   : > { %556 = vmatpush3.bf16.msra.mxu0 %v555_v13 }
  0x6f   : > { %557 = vmatprep.subr.bf16.mxu0 %v795_v0 }
  0x72   : > { %559 = vmatpush3.bf16.msra.mxu0 %v558_v16 }
  0x73   : > { %560 = vmatprep.subr.bf16.mxu0 %v795_v0 }
  0x76   : > { %562 = vmatpush3.bf16.msra.mxu0 %v561_v19 }
  0x77   : > { %563 = vmatprep.subr.bf16.mxu0 %v795_v0 }
  0x7a   : > { %565 = vmatpush3.bf16.msra.mxu0 %v564_v22 }
  0x7b   : > { %566 = vmatprep.subr.bf16.mxu0 %v795_v0 }
  0x7e   : > { %568 = vmatpush3.bf16.msra.mxu0 %v567_v25 }
  0x81   : > { %543 = vmatmul.mubr.f32.vlgmr.msra.gmra.mrb[0].mxu0 %v211_v26 }
 0x14f   : > { %301 = sbr.rel (%p483_p5) target bundleno = 358 (0x166), region = 48 }
 0x154   : > { %v294_v27 = vpop.f32.mrb[0].mxu0 }
 0x155   : > { %v544_v28 = vpop.f32.mrb[1].mxu0  ;;  %v309_v29 = vrot.slane (!%p483_p5), %v294_v27, 4  ;;  %v318_v30 = vmul.f32 (!%p483_p5), %v294_v27, %v294_v27 }
 0x157   : > { %v310_v32 = vadd.f32 %v309_v29, %v294_v27  ;;  %v319_v33 = vrot.slane %v318_v30, 4 }
 0x159   : > { %v311_v34 = vrot.slane %v310_v32, 2  ;;  %v320_v35 = vadd.f32 %v319_v33, %v318_v30 }
 0x15b   : > { %v312_v36 = vadd.f32 %v311_v34, %v310_v32  ;;  %v321_v37 = vrot.slane %v320_v35, 2 }
 0x15d   : > { %v313_v38 = vrot.slane %v312_v36, 1  ;;  %v322_v39 = vadd.f32 %v321_v37, %v320_v35 }
 0x15f   : > { %v314_v41 = vadd.f32 %v313_v38, %v312_v36  ;;  %v323_v42 = vrot.slane %v322_v39, 1 }
 0x161   : > { %v315_v44 = vadd.f32 %v314_v41, %v308_v40  ;;  %v324_v45 = vadd.f32 %v323_v42, %v322_v39 }
 0x163   : > { %316 = vst [vmem:[#allocation2] sm:$0x1] %v315_v44  ;;  %v325_v46 = vadd.f32 %v324_v45, %v317_v43 }
 0x165   : > { %326 = vst [vmem:[#allocation3] sm:$0x1] %v325_v46 }
 0x166 PF: > { %p327_p8 = scmp.eq.s32.totalorder %s780_s12, 1 }
 0x167   : > { %v340_v55 = vld [vmem:[#allocation9] sm:$0x1] (%p327_p8)  ;;  %v344_v58 = vld [vmem:[#allocation9 + $0x1] sm:$0x1] (%p327_p8) }
 0x168   : > { %332 = sbr.rel (!%p327_p8) target bundleno = 391 (0x187), region = 56 }
 0x16a   : > { %v333_v47 = vld [vmem:[#allocation2] sm:$0x1] (%p327_p8) }
 0x16b   : > { %v334_v49 = vmul.f32 (%p327_p8), 0.125, %v333_v47 }
 0x16c   : > { %v335_v48 = vld [vmem:[#allocation3] sm:$0x1] (%p327_p8) }
 0x16d   : > { %v336_v50 = vmul.f32 (%p327_p8), 0.125, %v335_v48  ;;  %v337_v51 = vmul.f32 (%p327_p8), %v334_v49, %v334_v49 }
 0x16f   : > { %v338_v52 = vsub.f32 %v336_v50, %v337_v51 }
 0x171   : > { %v339_v53 = vmax.f32 %v338_v52, 0.0 }
 0x173   : > { %v341_v54 = vadd.f32 1e-05, %v339_v53 }
 0x175   : > { %642 = vrsqrt.f32 %v341_v54 }
 0x17f   : > { %v643_v56 = vpop.eup %642 }
 0x180   : > { %v343_v57 = vmul.f32 %v643_v56, %v340_v55 }
 0x182   : > { %347 = vst [vmem:[#allocation2] sm:$0x1] %v343_v57  ;;  %v345_v59 = vmul.f32 %v343_v57, %v334_v49 }
 0x184   : > { %v346_v60 = vsub.f32 %v344_v58, %v345_v59 }
 0x186   : > { %348 = vst [vmem:[#allocation3] sm:$0x1] %v346_v60 }
 0x187 PF: > { %p485_p6 = scmp.ne.s32.totalorder %s780_s12, 1 }
 0x189   : > { %351 = sbr.rel (%p485_p6) target bundleno = 403 (0x193), region = 60  ;;  %v486_v61 = vld [vmem:[#allocation2] ss:$0 sm:$0xff] (!%p485_p6) }
 0x18a   : > { %v359_v63 = vmul.f32 (!%p485_p6), %v486_v61, %v294_v27 }
 0x18d   : > { %v487_v62 = vld [vmem:[#allocation3] ss:$0 sm:$0xff] (!%p485_p6) }
 0x18e   : > { %v367_v0 = vadd.f32 (!%p485_p6), %v487_v62, %v359_v63 }
 0x190   : > { %v368_v1 = vmax.f32 %v367_v0, 0.0 }
 0x192   : > { %369 = vst [vmem:[#allocation10] sm:$0xff] %v368_v1 }
 0x193 PF: > { %p941_p9 = scmp.eq.s32.totalorder %s473_s17, 1  ;;  %s799_s20 = smov [#allocation10]  }
 0x194   : > { %s385_s21 = sshll.u32 %s799_s20, 4  ;;  %s386_s21 = int_to_ptr.vmem [resolvable:$true] %s385_s21 }
 0x195   : > { %s728_s29 = scalar_lea.vmem %s386_s21, 128  ;;  %s734_s12 = scalar_lea.vmem %s386_s21, 256 }
 0x196   : > { %p729_p10 = scmp.ne.s32.totalorder %s386_s21, %s728_s29  ;;  %p735_p13 = scmp.lt.s32.totalorder %s386_s21, %s386_s21 }
 0x197   : > { %p736_p0 = scmp.lt.s32.totalorder %s734_s12, %s728_s29 }
 0x198   : > { %p730_p11 = pnand %p729_p10, %p941_p9 }
 0x199   : > { %p737_p1 = por %p736_p0, %p735_p13 }
 0x19a   : > { %p731_p12 = pneg %p730_p11 }
 0x19c   : > { %p738_p4 = pnand %p737_p1, %p731_p12 }
 0x19e   : > { %741 = shalt.err (!%p738_p4)
}
 0x19f   : > { %s742_s30 = scalar_lea.hbm %s978_s3, 128 }
 0x1a0   : > { %p743_p7 = scmp.ne.s32.totalorder %s978_s3, %s742_s30  ;;  %p748_p5 = scmp.lt.u32.totalorder %s742_s30, %s978_s3 }
 0x1a2   : > { %p744_p2 = pnand %p743_p7, %p941_p9 }
 0x1a4   : > { %p745_p3 = pneg %p744_p2 }
 0x1a6   : > { %p750_p8 = pnand %p748_p5, %p745_p3 }
 0x1a8   : > { %753 = shalt.err (!%p750_p8)
}
 0x1a9   : > { %582 = dma.vmem_to_hbm [thread:$0]  (%p941_p9), %s386_s21, 128, %s978_s3, [#allocation6]  }
 0x1aa PF: > { %p606_p6 = scmp.ge.s32.totalorder %s788_s14, 2  ;;  %p607_p10 = scmp.eq.s32.totalorder %s474_s18, 1 }
 0x1ac   : > { %p596_p11 = pnand %p607_p10, %p606_p6 }
 0x1ae   : > { %775 = dma.done.wait (!%p596_p11), [#allocation6], 128  }
 0x1af   : > { %777 = vsyncadd (!%p596_p11), [#allocation6], 4294967168  ;;  %s18_s14 = sadd.s32 1, %s788_s14   ;;  %s991_s12 = smov %s784_s13 }
 0x1b0   : > { %p15_p12 = scmp.ge.s32.totalorder %s18_s14, 4   ;;  %s992_s13 = smov %s994_s22 }
 0x1b2   :  { %17 = sbr.rel (!%p15_p12) target bundleno = 5 (0x5), region = 94 }
 0x1b9   :  { %403 = vsyncpa [#allocation5], 1 }
 0x1ba   :  { %405 = vsyncpa [#allocation5 + $0x1], 1 }
 0x1bb   :  { %406 = vsyncpa [#allocation8], 1 }
 0x1bc   :  { %407 = vsyncpa [#allocation6], 1 }
 0x1bd   :  { %409 = vsyncpa [#allocation6 + $0x1], 1 }

</bundles_post_ra>
